<compile_context>
chip_gen: v6e
topology: v6e:2x2x1
jax: 0.10.0
libtpu: 0.0.40
codegen_flags: <defaults>
</compile_context>

<pallas_src>
import jax
import jax.numpy as jnp
from jax.experimental import pallas as pl
from jax.experimental.pallas import tpu as pltpu


def cartpole_mlp_kernel(x_ref, w1_ref, b1_ref, w2_ref, b2_ref, w3d_ref, b3d_ref, o_ref):
    x = x_ref[...]                                                        # (4, TB) f32

    # Layer 1: (32, 4)bf16 @ (4, TB)bf16 -> (32, TB)f32; bias + ReLU in f32.
    h1 = jnp.dot(w1_ref[...], x.astype(jnp.bfloat16),
                 preferred_element_type=jnp.float32)
    h1 = jnp.maximum(h1 + b1_ref[...], 0.0)                               # (32,1) lane-broadcast bias

    # Layer 2: (32, 32)bf16 @ (32, TB)bf16 -> (32, TB)f32.
    h2 = jnp.dot(w2_ref[...], h1.astype(jnp.bfloat16),
                 preferred_element_type=jnp.float32)
    h2 = jnp.maximum(h2 + b2_ref[...], 0.0)

    # Layer 3 + softmax, folded: d = (w3[1]-w3[0]) @ h2 + (b3[1]-b3[0]).
    d = jnp.dot(w3d_ref[...], h2.astype(jnp.bfloat16),
                preferred_element_type=jnp.float32) + b3d_ref[...]        # (1, TB) f32
    # sigmoid(d) via exp (EUP) + approximate reciprocal (EUP) — no f32 divide.
    p1 = pl.reciprocal(1.0 + jnp.exp(-d), approx=True)                    # (1, TB)
    o_ref[1:2, :] = p1
    o_ref[0:1, :] = 1.0 - p1


def _round_up(n, m):
    return ((n + m - 1) // m) * m


def _choose_tile(batch, tb):
    """Lane-tile size: multiple of 128, big enough to amortize per-step overhead,
    capped so B >= 256 always produces >= 2 grid steps (keeps both v7x TCs busy)."""
    b_pad = _round_up(max(int(batch), 1), 128)
    if b_pad >= 256:
        tb_eff = min(int(tb), _round_up(b_pad // 2, 128))
    else:
        tb_eff = 128
    return max(128, min(tb_eff, b_pad))


def prepare_params(params):
    """One-time parameter prep (hoisted out of the hot path).

    Matmul weights -> bf16 (MXU-native); biases stay f32 as (out, 1) columns for
    lane-broadcast adds.  Layer 3 + softmax are pre-folded into a single
    difference row w3d = w3[1]-w3[0] (computed in f32, then cast)."""
    w3 = params["w3"].astype(jnp.float32)                      # (2, 32)
    b3 = params["b3"].astype(jnp.float32)                      # (2,)
    w3d = (w3[1] - w3[0]).reshape(1, 32)
    b3d = (b3[1] - b3[0]).reshape(1, 1)
    return (
        params["w1"].astype(jnp.bfloat16),                     # (32, 4)
        params["b1"].reshape(32, 1).astype(jnp.float32),        # (32, 1)
        params["w2"].astype(jnp.bfloat16),                      # (32, 32)
        params["b2"].reshape(32, 1).astype(jnp.float32),        # (32, 1)
        w3d.astype(jnp.bfloat16),                               # (1, 32)
        b3d.astype(jnp.float32),                                # (1, 1)
    )


def cartpole_forward_feature_major(x_fm, prepared, *, tb=32768):
    """Fast-path contract: x_fm (4, B) f32, batch on lanes -> (2, B) f32 probs.

    Zero wrapper-side HBM ops: no pad (Pallas clips/masks the ragged last tile),
    no slice, no transpose.  Working set at tb=32768 is ~10-15 MiB, well inside
    the 64 MiB limit below on every generation (v7x physical VMEM = 64 MiB/TC).
    """
    B = x_fm.shape[1]
    TB = _choose_tile(B, tb)
    grid = (pl.cdiv(B, TB),)

    return pl.pallas_call(
        cartpole_mlp_kernel,
        out_shape=jax.ShapeDtypeStruct((2, B), jnp.float32),
        grid=grid,
        in_specs=[
            pl.BlockSpec((4, TB), lambda i: (0, i)),     # x tile marches over the batch
            pl.BlockSpec((32, 4), lambda i: (0, 0)),     # weights/biases: VMEM-resident
            pl.BlockSpec((32, 1), lambda i: (0, 0)),
            pl.BlockSpec((32, 32), lambda i: (0, 0)),
            pl.BlockSpec((32, 1), lambda i: (0, 0)),
            pl.BlockSpec((1, 32), lambda i: (0, 0)),
            pl.BlockSpec((1, 1), lambda i: (0, 0)),
        ],
        out_specs=pl.BlockSpec((2, TB), lambda i: (0, i)),
        compiler_params=pltpu.CompilerParams(
            dimension_semantics=("parallel",),           # batch tiles across v7x's 2 TCs
            vmem_limit_bytes=64 * 1024 * 1024,           # <= physical on v5e/v6e/v7x
        ),
    )(x_fm.astype(jnp.float32), *prepared)


def cartpole_forward(x, prepared, *, tb=32768):
    """Module-compatible contract: x (B, 4) f32 -> (B, 2) softmax probabilities.
    The in/out transposes are the only wrapper HBM ops; hot loops should prefer
    cartpole_forward_feature_major and keep data feature-major end to end."""
    out_fm = cartpole_forward_feature_major(x.astype(jnp.float32).T, prepared, tb=tb)
    return out_fm.T


def init_params(key):
    """Deterministic synthetic params matching torch.nn.Linear shapes/init."""
    ks = jax.random.split(key, 6)

    def unif(k, shape, fan_in):
        bound = 1.0 / jnp.sqrt(fan_in)
        return jax.random.uniform(k, shape, jnp.float32, -bound, bound)

    return {
        "w1": unif(ks[0], (32, 4), 4),   "b1": unif(ks[1], (32,), 4),
        "w2": unif(ks[2], (32, 32), 32), "b2": unif(ks[3], (32,), 32),
        "w3": unif(ks[4], (2, 32), 32),  "b3": unif(ks[5], (2,), 32),
    }


def reference_forward(x, p):
    """Pure f32 JAX reference matching the PyTorch module."""
    h1 = jnp.maximum(x @ p["w1"].T + p["b1"], 0.0)
    h2 = jnp.maximum(h1 @ p["w2"].T + p["b2"], 0.0)
    logits = h2 @ p["w3"].T + p["b3"]
    return jax.nn.softmax(logits, axis=-1)


if __name__ == "__main__":
    key = jax.random.PRNGKey(0)
    kx, kx2, kp = jax.random.split(key, 3)
    params = init_params(kp)
    prepared = prepare_params(params)          # hoisted: done once, reused every call

    # Small batch through the module-compatible (B, 4) -> (B, 2) wrapper.
    B = 8
    x = jax.random.normal(kx, (B, 4), dtype=jnp.float32)
    out = jax.block_until_ready(cartpole_forward(x, prepared))
    ref = reference_forward(x, params)
    assert out.shape == (B, 2)
    # bf16 matmul path -> loosened tolerance vs the f32 reference.
    assert jnp.allclose(out, ref, atol=3e-2), "mismatch vs JAX reference (B=8)"
    assert jnp.allclose(jnp.sum(out, axis=-1), 1.0, atol=1e-4), "softmax rows must sum to 1"

    # Multi-tile path via the zero-copy feature-major entry point; tb=256 forces
    # a 2-step grid with a ragged (masked) last tile.
    B2 = 300
    x2 = jax.random.normal(kx2, (B2, 4), dtype=jnp.float32)
    out2_fm = jax.block_until_ready(
        cartpole_forward_feature_major(x2.T, prepared, tb=256))
    ref2 = reference_forward(x2, params)
    assert out2_fm.shape == (2, B2)
    assert jnp.allclose(out2_fm.T, ref2, atol=3e-2), "mismatch vs JAX reference (B=300)"
    assert jnp.allclose(jnp.sum(out2_fm, axis=0), 1.0, atol=1e-4)

    print("KERNEL_OK")
</pallas_src>

<mosaic_0001>
module attributes {stable_mosaic.version = 11 : i64} {
  func.func @cartpole_mlp_kernel(%arg0: i32, %arg1: memref<4x128xf32, #tpu.memory_space<vmem>>, %arg2: memref<32x4xbf16, #tpu.memory_space<vmem>>, %arg3: memref<32x1xf32, #tpu.memory_space<vmem>>, %arg4: memref<32x32xbf16, #tpu.memory_space<vmem>>, %arg5: memref<32x1xf32, #tpu.memory_space<vmem>>, %arg6: memref<1x32xbf16, #tpu.memory_space<vmem>>, %arg7: memref<1x1xf32, #tpu.memory_space<vmem>>, %arg8: memref<2x128xf32, #tpu.memory_space<vmem>>) attributes {dimension_semantics = [#tpu.dimension_semantics<parallel>], iteration_bounds = array<i64: 1>, scalar_prefetch = 0 : i64, scratch_operands = 0 : i64, tpu.core_type = #tpu.core_type<tc>, window_params = [{transform_indices = @transform_0, window_bounds = array<i64: 4, 128>}, {pipeline_mode = #tpu.pipeline_mode<synchronous>, transform_indices = @transform_1, window_bounds = array<i64: 32, 4>}, {pipeline_mode = #tpu.pipeline_mode<synchronous>, transform_indices = @transform_2, window_bounds = array<i64: 32, 1>}, {pipeline_mode = #tpu.pipeline_mode<synchronous>, transform_indices = @transform_3, window_bounds = array<i64: 32, 32>}, {pipeline_mode = #tpu.pipeline_mode<synchronous>, transform_indices = @transform_4, window_bounds = array<i64: 32, 1>}, {pipeline_mode = #tpu.pipeline_mode<synchronous>, transform_indices = @transform_5, window_bounds = array<i64: 1, 32>}, {pipeline_mode = #tpu.pipeline_mode<synchronous>, transform_indices = @transform_6, window_bounds = array<i64: 1, 1>}, {transform_indices = @transform_7, window_bounds = array<i64: 2, 128>}]} {
    %c0 = arith.constant 0 : index
    %c0_0 = arith.constant 0 : index
    %0 = vector.load %arg1[%c0, %c0_0] : memref<4x128xf32, #tpu.memory_space<vmem>>, vector<4x128xf32>
    %c0_1 = arith.constant 0 : index
    %c0_2 = arith.constant 0 : index
    %1 = vector.load %arg2[%c0_1, %c0_2] : memref<32x4xbf16, #tpu.memory_space<vmem>>, vector<32x4xbf16>
    %2 = arith.truncf %0 : vector<4x128xf32> to vector<4x128xbf16>
    %cst = arith.constant dense<0.000000e+00> : vector<32x128xf32>
    %3 = tpu.matmul %1, %2, %cst {dimension_numbers = #tpu.dot_dimension_numbers<[1], [0], [0], [1], [0, 0, 1, 1], [], []>} : vector<32x4xbf16>, vector<4x128xbf16>, vector<32x128xf32> -> vector<32x128xf32>
    %c0_3 = arith.constant 0 : index
    %c0_4 = arith.constant 0 : index
    %4 = vector.load %arg3[%c0_3, %c0_4] : memref<32x1xf32, #tpu.memory_space<vmem>>, vector<32x1xf32>
    %5 = vector.broadcast %4 : vector<32x1xf32> to vector<32x128xf32>
    %6 = arith.addf %3, %5 : vector<32x128xf32>
    %cst_5 = arith.constant 0.000000e+00 : f32
    %7 = vector.broadcast %cst_5 : f32 to vector<32x128xf32>
    %8 = arith.maximumf %6, %7 : vector<32x128xf32>
    %c0_6 = arith.constant 0 : index
    %c0_7 = arith.constant 0 : index
    %9 = vector.load %arg4[%c0_6, %c0_7] : memref<32x32xbf16, #tpu.memory_space<vmem>>, vector<32x32xbf16>
    %10 = arith.truncf %8 : vector<32x128xf32> to vector<32x128xbf16>
    %cst_8 = arith.constant dense<0.000000e+00> : vector<32x128xf32>
    %11 = tpu.matmul %9, %10, %cst_8 {dimension_numbers = #tpu.dot_dimension_numbers<[1], [0], [0], [1], [0, 0, 1, 1], [], []>} : vector<32x32xbf16>, vector<32x128xbf16>, vector<32x128xf32> -> vector<32x128xf32>
    %c0_9 = arith.constant 0 : index
    %c0_10 = arith.constant 0 : index
    %12 = vector.load %arg5[%c0_9, %c0_10] : memref<32x1xf32, #tpu.memory_space<vmem>>, vector<32x1xf32>
    %13 = vector.broadcast %12 : vector<32x1xf32> to vector<32x128xf32>
    %14 = arith.addf %11, %13 : vector<32x128xf32>
    %cst_11 = arith.constant 0.000000e+00 : f32
    %15 = vector.broadcast %cst_11 : f32 to vector<32x128xf32>
    %16 = arith.maximumf %14, %15 : vector<32x128xf32>
    %c0_12 = arith.constant 0 : index
    %c0_13 = arith.constant 0 : index
    %17 = vector.load %arg6[%c0_12, %c0_13] : memref<1x32xbf16, #tpu.memory_space<vmem>>, vector<1x32xbf16>
    %18 = arith.truncf %16 : vector<32x128xf32> to vector<32x128xbf16>
    %cst_14 = arith.constant dense<0.000000e+00> : vector<1x128xf32>
    %19 = tpu.matmul %17, %18, %cst_14 {dimension_numbers = #tpu.dot_dimension_numbers<[1], [0], [0], [1], [0, 0, 1, 1], [], []>} : vector<1x32xbf16>, vector<32x128xbf16>, vector<1x128xf32> -> vector<1x128xf32>
    %c0_15 = arith.constant 0 : index
    %c0_16 = arith.constant 0 : index
    %20 = vector.load %arg7[%c0_15, %c0_16] : memref<1x1xf32, #tpu.memory_space<vmem>>, vector<1x1xf32>
    %21 = vector.broadcast %20 : vector<1x1xf32> to vector<1x128xf32>
    %22 = arith.addf %19, %21 : vector<1x128xf32>
    %cst_17 = arith.constant 0.000000e+00 : f32
    %23 = vector.broadcast %cst_17 : f32 to vector<1x128xf32>
    %24 = arith.subf %23, %22 : vector<1x128xf32>
    %25 = math.exp %24 : vector<1x128xf32>
    %cst_18 = arith.constant 1.000000e+00 : f32
    %26 = vector.broadcast %cst_18 : f32 to vector<1x128xf32>
    %27 = arith.addf %26, %25 : vector<1x128xf32>
    %28 = tpu.reciprocal %27 {approx = true} : vector<1x128xf32> -> vector<1x128xf32>
    %c1 = arith.constant 1 : index
    %c0_19 = arith.constant 0 : index
    %29 = vector.load %arg8[%c1, %c0_19] : memref<2x128xf32, #tpu.memory_space<vmem>>, vector<1x128xf32>
    tpu.vector_store %arg8[%c1, %c0_19], %28 {strides = array<i32>} : memref<2x128xf32, #tpu.memory_space<vmem>>, vector<1x128xf32>,
    %cst_20 = arith.constant 1.000000e+00 : f32
    %30 = vector.broadcast %cst_20 : f32 to vector<1x128xf32>
    %31 = arith.subf %30, %28 : vector<1x128xf32>
    %c0_21 = arith.constant 0 : index
    %c0_22 = arith.constant 0 : index
    %32 = vector.load %arg8[%c0_21, %c0_22] : memref<2x128xf32, #tpu.memory_space<vmem>>, vector<1x128xf32>
    tpu.vector_store %arg8[%c0_21, %c0_22], %31 {strides = array<i32>} : memref<2x128xf32, #tpu.memory_space<vmem>>, vector<1x128xf32>,
    return
  }
  func.func @transform_0(%arg0: i32) -> (i32, i32) {
    %c0_i32 = arith.constant 0 : i32
    %c0_i32_0 = arith.constant 0 : i32
    return %c0_i32, %arg0 : i32, i32
  }
  func.func @transform_1(%arg0: i32) -> (i32, i32) {
    %c0_i32 = arith.constant 0 : i32
    %c0_i32_0 = arith.constant 0 : i32
    %c0_i32_1 = arith.constant 0 : i32
    return %c0_i32, %c0_i32_0 : i32, i32
  }
  func.func @transform_2(%arg0: i32) -> (i32, i32) {
    %c0_i32 = arith.constant 0 : i32
    %c0_i32_0 = arith.constant 0 : i32
    %c0_i32_1 = arith.constant 0 : i32
    return %c0_i32, %c0_i32_0 : i32, i32
  }
  func.func @transform_3(%arg0: i32) -> (i32, i32) {
    %c0_i32 = arith.constant 0 : i32
    %c0_i32_0 = arith.constant 0 : i32
    %c0_i32_1 = arith.constant 0 : i32
    return %c0_i32, %c0_i32_0 : i32, i32
  }
  func.func @transform_4(%arg0: i32) -> (i32, i32) {
    %c0_i32 = arith.constant 0 : i32
    %c0_i32_0 = arith.constant 0 : i32
    %c0_i32_1 = arith.constant 0 : i32
    return %c0_i32, %c0_i32_0 : i32, i32
  }
  func.func @transform_5(%arg0: i32) -> (i32, i32) {
    %c0_i32 = arith.constant 0 : i32
    %c0_i32_0 = arith.constant 0 : i32
    %c0_i32_1 = arith.constant 0 : i32
    return %c0_i32, %c0_i32_0 : i32, i32
  }
  func.func @transform_6(%arg0: i32) -> (i32, i32) {
    %c0_i32 = arith.constant 0 : i32
    %c0_i32_0 = arith.constant 0 : i32
    %c0_i32_1 = arith.constant 0 : i32
    return %c0_i32, %c0_i32_0 : i32, i32
  }
  func.func @transform_7(%arg0: i32) -> (i32, i32) {
    %c0_i32 = arith.constant 0 : i32
    %c0_i32_0 = arith.constant 0 : i32
    return %c0_i32, %arg0 : i32, i32
  }
}

</mosaic_0001>

<bundles_post_ra>
// kernel: tpu_custom_call.1
= control target key start
LH: loop header
LB: loop body
LE: loop exit
PB: predicated region body
PF: predicated region fallthrough
CT: control target
= control target key end

     0   :  { %s485_s0 = inlined_call_operand.vmem [shape: f32[4,8], index: 0, kind: input, shape index: {}]   ;;  %s486_s1 = inlined_call_operand.vmem [shape: bf16[32,4], index: 1, kind: input, shape index: {}]   ;;  %s487_s2 = inlined_call_operand.vmem [shape: f32[32,1], index: 2, kind: input, shape index: {}]   ;;  %s488_s3 = inlined_call_operand.vmem [shape: bf16[32,32], index: 3, kind: input, shape index: {}]   ;;  %s489_s4 = inlined_call_operand.vmem [shape: f32[32,1], index: 4, kind: input, shape index: {}]   ;;  %s490_s5 = inlined_call_operand.vmem [shape: bf16[1,32], index: 5, kind: input, shape index: {}]   ;;  %s491_s6 = inlined_call_operand.<no memory space> [shape: f32[1,1], index: 6, kind: input, shape index: {}]   ;;  %s492_s7 = inlined_call_operand.hbm [shape: f32[2,8], index: 7, kind: output, shape index: {}]  }
   0x1   :  { %v12_v0 = vstv %s491_s6 }
   0x2   :  { %13 = vst [vmem:[#allocation2] sm:$0x1] %v12_v0 }
   0x3   :  { %v30_v1 = vld [vmem:[%s485_s0] sm:$0xf]  ;;  %vm77_vm0 = vcmask 1041408   ;;  %vm70_vm1 = vcmask 31744   ;;  %v38_v4 = vld [vmem:[%s487_s2 + $0x10] sm:$0xff]  ;;  %v361_v6 = vld [vmem:[%s486_s1 + $0x8] sm:$0xff]  }
   0x4   :  { %v360_v2 = vld [vmem:[%s486_s1] sm:$0xff]   ;;  %v35_v3 = vpack.c.bf16 %v30_v1, %v30_v1  ;;  %v390_v7 = vmov 0   ;;  %v39_v9 = vld [vmem:[%s487_s2 + $0x18] sm:$0xff] }
   0x5   :  { %333 = vmatprep.mubr.msk.bf16.mxu0 %vm70_vm1, %v360_v2  ;;  %358 = vset.pattern.permute.xlu0 %v390_v7  ;;  %v36_v8 = vld [vmem:[%s487_s2] sm:$0xff] }
   0x6   :  { %353 = vmatprep.subr.msk.bf16.mxu0 %vm77_vm0, %v35_v3  ;;  %v79_v5 = vsel %vm77_vm0, %v35_v3, 0  ;;  %52 = vperm.xlu0 %358, %v38_v4  }
   0x7   :  { %332 = vmatpush3.bf16.msra.mxu0 %v79_v5  ;;  %359 = vset.pattern.permute.xlu1 %v390_v7 }
   0x8   :  { %42 = vperm.xlu1 %359, %v36_v8  }
   0x9   :  { %14 = vsyncpa [#allocation4], 0  ;;  %v37_v10 = vld [vmem:[%s487_s2 + $0x8] sm:$0xff]  ;;  %v142_v11 = vld [vmem:[%s489_s4 + $0x10] sm:$0xff]  ;;  %vm174_vm2 = vcmask 261120   ;;  %v391_v36 = vmov 0.0   ;;  %v243_v56 = vlaneseq }
   0xa   :  { %334 = vmatmul.mubr.msk.bf16.vlgmr.msra.gmra.mxu0 %vm70_vm1, %v361_v6  ;;  %57 = vperm.xlu0 %358, %v39_v9   ;;  %v143_v12 = vld [vmem:[%s489_s4 + $0x18] sm:$0xff]  ;;  %v140_v13 = vld [vmem:[%s489_s4] sm:$0xff]  ;;  %v141_v14 = vld [vmem:[%s489_s4 + $0x8] sm:$0xff]  ;;  %vm392_vm3 = vmmov 0   ;;  %s393_s25 = smov [#allocation3]  }
   0xb   :  { %v237_v15 = vld [vmem:[#allocation2] sm:$0x1]  ;;  %v363_v35 = vld [vmem:[%s488_s3 + $0x8] sm:$0xff]   ;;  %345 = vmatprep.subr.bf16.mxu0 %v391_v36  ;;  %349 = vmatprep.mubr.msk.bf16.mxu0 %vm392_vm3, %v391_v36  ;;  %v244_v57 = vshrl.u32 %v243_v56, 7 }
   0xc   :  { %47 = vperm.xlu1 %359, %v37_v10   ;;  %v362_v16 = vld [vmem:[%s488_s3] sm:$0xff]  }
   0xd   :  { %341 = vmatprep.mubr.msk.bf16.mxu1 %vm174_vm2, %v362_v16  ;;  %v234_v55 = vld [vmem:[%s490_s5] sm:$0x1]  ;;  %v245_v58 = vsub.s32 0, %v244_v57  ;;  %s304_s5 = sshll.u32 %s393_s25, 4  ;;  %s305_s5 = int_to_ptr.vmem [resolvable:$true] %s304_s5 }
   0xe   :  { %156 = vperm.xlu0 %358, %v142_v11   ;;  %s368_s26 = scalar_lea.vmem %s305_s5, 32  ;;  %p373_p1 = scmp.lt.s32.totalorder %s305_s5, %s305_s5 }
   0xf   :  { %p369_p0 = scmp.ne.s32.totalorder %s305_s5, %s368_s26  ;;  %p374_p2 = scmp.lt.s32.totalorder %s368_s26, %s368_s26 }
  0x10   :  { %161 = vperm.xlu1 %359, %v143_v12  }
  0x11   :  { %p375_p3 = por %p374_p2, %p373_p1 }
  0x12   :  { %146 = vperm.xlu0 %358, %v140_v13  }
  0x13   :  { %p376_p4 = pnand %p375_p3, %p369_p0 }
  0x14   :  { %151 = vperm.xlu1 %359, %v141_v14  }
  0x16   :  { %240 = vperm.xlu0 %358, %v237_v15  }
  0x81   :  { %v53_v17 = vpop.permute.xlu0 %52 }
  0x83   :  { %v43_v18 = vpop.permute.xlu1 %42 }
  0x85   :  { %v58_v22 = vpop.permute.xlu0 %57 }
  0x87   :  { %v48_v26 = vpop.permute.xlu1 %47 }
  0x89   :  { %v157_v37 = vpop.permute.xlu0 %156 }
  0x8b   :  { %v162_v38 = vpop.permute.xlu1 %161 }
  0x8d   :  { %v147_v43 = vpop.permute.xlu0 %146 }
  0x8f   :  { %v152_v45 = vpop.permute.xlu1 %151 }
  0x91   :  { %v241_v59 = vpop.permute.xlu0 %240 }
  0x92   :  { %v246_v60 = vrot.slane %v241_v59, %v245_v58 }
  0xca   :  { %v335_v19 = vpop.f32.mrf.mxu0 }
  0xcb   :  { %v124_v21 = vadd.f32 %v335_v19, %v53_v17 }
  0xcc   :  { %v115_v20 = vpop.f32.mrf.mxu0 }
  0xcd   :  { %v116_v24 = vadd.f32 %v115_v20, %v43_v18  ;;  %v132_v28 = vmax.f32 %v124_v21, 0.0 }
  0xce   :  { %v336_v23 = vpop.f32.mrf.mxu0 }
  0xcf   :  { %v127_v25 = vadd.f32 %v336_v23, %v58_v22  ;;  %v130_v31 = vmax.f32 %v116_v24, 0.0 }
  0xd0   :  { %v118_v27 = vpop.f32.mrf.mxu0 }
  0xd1   :  { %v133_v29 = vmax.f32 %v127_v25, 0.0  ;;  %v119_v30 = vadd.f32 %v118_v27, %v48_v26 }
  0xd3   :  { %v131_v32 = vmax.f32 %v119_v30, 0.0  ;;  %v139_v33 = vpack.c.bf16 %v133_v29, %v132_v28 }
  0xd5   :  { %v138_v34 = vpack.c.bf16 %v131_v32, %v130_v31  ;;  %337 = vmatprep.subr.bf16.mxu1 %v139_v33 }
  0xd6   :  { %338 = vmatpush3.bf16.msra.mxu1 %v139_v33 }
  0xd7   :  { %339 = vmatprep.subr.bf16.mxu1 %v138_v34 }
  0xda   :  { %340 = vmatpush3.bf16.msra.mxu1 %v138_v34 }
  0xdd   :  { %342 = vmatmul.mubr.msk.bf16.vlgmr.msra.gmra.mxu1 %vm174_vm2, %v363_v35 }
 0x19d   :  { %v343_v39 = vpop.f32.mrf.mxu1 }
 0x19e   :  { %v224_v41 = vadd.f32 %v343_v39, %v157_v37 }
 0x19f   :  { %v215_v40 = vpop.f32.mrf.mxu1 }
 0x1a0   :  { %v232_v47 = vmax.f32 %v224_v41, 0.0  ;;  %v216_v48 = vadd.f32 %v215_v40, %v147_v43 }
 0x1a1   :  { %v344_v42 = vpop.f32.mrf.mxu1 }
 0x1a2   :  { %v227_v44 = vadd.f32 %v344_v42, %v162_v38  ;;  %v230_v53 = vmax.f32 %v216_v48, 0.0 }
 0x1a3   :  { %v218_v46 = vpop.f32.mrf.mxu1 }
 0x1a4   :  { %v233_v49 = vmax.f32 %v227_v44, 0.0  ;;  %v219_v50 = vadd.f32 %v218_v46, %v152_v45 }
 0x1a6   :  { %v236_v51 = vpack.c.bf16 %v233_v49, %v232_v47  ;;  %v231_v52 = vmax.f32 %v219_v50, 0.0 }
 0x1a8   :  { %346 = vmatpush3.bf16.msra.mxu0 %v236_v51  ;;  %v235_v54 = vpack.c.bf16 %v231_v52, %v230_v53 }
 0x1a9   :  { %347 = vmatprep.subr.bf16.mxu0 %v391_v36 }
 0x1ac   :  { %348 = vmatpush3.bf16.msra.mxu0 %v235_v54 }
 0x1af   :  { %350 = vmatmul.mubr.msk.bf16.vlgmr.msra.gmra.mxu0 %vm174_vm2, %v234_v55 }
 0x26f   :  { %v284_v61 = vpop.f32.mrf.mxu0 }
 0x270   :  { %v285_v62 = vadd.f32 %v284_v61, %v246_v60 }
 0x271   :  { %v351_v63 = vpop.f32.mrf.mxu0 }
 0x272   :  { %v290_v0 = vsub.f32 0.0, %v285_v62 }
 0x273   :  { %v287_v1 = vpop.f32.mrf.mxu0 }
 0x274   :  { %v291_v2 = vmul.f32 1.442695, %v290_v0 }
 0x275   :  { %v352_v3 = vpop.f32.mrf.mxu0 }
 0x276   :  { %364 = vpow2.f32 %v291_v2 }
 0x283   :  { %v365_v4 = vpop.eup %364 }
 0x284   :  { %v293_v5 = vadd.f32 1.0, %v365_v4 }
 0x286   :  { %366 = vrcp.f32 %v293_v5 }
 0x293   :  { %v367_v6 = vpop.eup %366 }
 0x294   :  { %295 = vst [vmem:[#allocation3 + $0x1] sm:$0x1] %v367_v6  ;;  %v296_v7 = vsub.f32 1.0, %v367_v6 }
 0x296   :  { %297 = vst [vmem:[#allocation3] sm:$0x1] %v296_v7 }
 0x297   :  { %379 = shalt.err (!%p376_p4)
}
 0x298   :  { %307 = dma.vmem_to_hbm [thread:$0]  %s305_s5, 32, %s492_s7, [#allocation4]  }
 0x299   :  { %388 = dma.done.wait [#allocation4], 32  }
 0x29a   :  { %389 = vsyncadd [#allocation4], 4294967264 }
 0x29b   :  { %311 = vsyncpa [#allocation4], 1 }

</bundles_post_ra>
